<compile_context>
chip_gen: v7x
topology: tpu7x:2x2x1
jax: 0.10.0
libtpu: 0.0.40
codegen_flags: <defaults>
</compile_context>

<pallas_src>
import functools

import jax
import jax.numpy as jnp
from jax.experimental import pallas as pl
from jax.experimental.pallas import tpu as pltpu


# ---------------------------------------------------------------------------
# Generation-aware sizing
# ---------------------------------------------------------------------------

def _vmem_and_num_tc():
    """Best-effort (physical per-core VMEM bytes, TensorCores per chip)."""
    vmem = None
    try:
        vmem = int(pltpu.get_tpu_info().vmem_capacity_bytes)
    except Exception:
        vmem = None
    if not vmem:
        vmem = 64 * 1024 * 1024  # conservative: smallest per-core VMEM (v7x)
    # Heuristic: 64 MiB/core => v7x (2 TCs/chip); 128 MiB => v5e/v6e (1 TC).
    num_tc = 2 if vmem <= 64 * 1024 * 1024 else 1
    return vmem, num_tc


def _choose_bt(B, per_row_bytes, block_budget_bytes, num_tc):
    """Largest batch tile whose pipelined buffers fit the block budget."""
    bt = max(1, min(B, block_budget_bytes // max(per_row_bytes, 1)))
    if num_tc >= 2 and B >= 2:
        # Keep >= 2 grid steps so both v7x TensorCores get a batch tile.
        bt = min(bt, pl.cdiv(B, 2))
        # Prefer an even step count so neither core idles on the tail.
        g = pl.cdiv(B, bt)
        if g > 1 and g % 2 == 1:
            bt_even = pl.cdiv(B, g + 1)
            if bt_even >= 1 and pl.cdiv(B, bt_even) % 2 == 0:
                bt = bt_even
    return bt


# ---------------------------------------------------------------------------
# Fused kernel: whole (bt, C, HW) block resident in VMEM
# ---------------------------------------------------------------------------

def _se_fused_kernel(x_ref, w1_ref, w2_ref, o_ref, *, inv_hw):
    x = x_ref[...]                                               # (bt, C, HW)

    # Squeeze: global average pool over the spatial (lane) axis, f32 accum.
    y = jnp.sum(x, axis=-1, dtype=jnp.float32) * inv_hw          # (bt, C)

    # Excitation: Linear -> ReLU -> Linear -> Sigmoid (no biases).
    h = jnp.maximum(
        jnp.dot(y, w1_ref[...].astype(jnp.float32),
                preferred_element_type=jnp.float32), 0.0)        # (bt, Cr)
    s = jax.nn.sigmoid(
        jnp.dot(h, w2_ref[...].astype(jnp.float32),
                preferred_element_type=jnp.float32))             # (bt, C)

    # Scale: multiply in f32 (no-op for f32 storage, closer to the f32
    # reference for bf16 storage), cast only the product.
    o_ref[...] = (x.astype(jnp.float32) * s[:, :, None]).astype(o_ref.dtype)


def _se_fused(x3, w1, w2, *, bt, vmem_limit, inv_hw):
    B, C, HW = x3.shape
    Cr = w1.shape[1]
    grid_b = pl.cdiv(B, bt)   # ragged last block: rows independent, masked store

    return pl.pallas_call(
        functools.partial(_se_fused_kernel, inv_hw=inv_hw),
        out_shape=jax.ShapeDtypeStruct((B, C, HW), x3.dtype),
        grid_spec=pltpu.PrefetchScalarGridSpec(
            num_scalar_prefetch=0,
            grid=(grid_b,),
            in_specs=[
                pl.BlockSpec((bt, C, HW), lambda b: (b, 0, 0)),
                pl.BlockSpec((C, Cr), lambda b: (0, 0)),
                pl.BlockSpec((Cr, C), lambda b: (0, 0)),
            ],
            out_specs=pl.BlockSpec((bt, C, HW), lambda b: (b, 0, 0)),
        ),
        compiler_params=pltpu.CompilerParams(
            dimension_semantics=("parallel",),
            vmem_limit_bytes=vmem_limit,
        ),
    )(x3, w1, w2)


# ---------------------------------------------------------------------------
# Two-pass fallback: HW chunked (pool pass, then scale pass)
# ---------------------------------------------------------------------------

def _pool_kernel(x_ref, pooled_ref, acc_ref, *, hw_total, inv_hw):
    h = pl.program_id(1)

    @pl.when(h == 0)
    def _():
        acc_ref[...] = jnp.zeros_like(acc_ref)

    x = x_ref[...].astype(jnp.float32)                           # (1, C, hw_t)
    hw_t = x_ref.shape[-1]
    # Zero lanes past the true H*W on the (possibly ragged) last chunk so the
    # pooled sum stays exact.
    lane = jax.lax.broadcasted_iota(jnp.int32, x.shape, 2) + h * hw_t
    x = jnp.where(lane < hw_total, x, 0.0)
    acc_ref[...] += jnp.sum(x, axis=-1, keepdims=True)           # (1, C, 1)

    @pl.when(h == pl.num_programs(1) - 1)
    def _():
        pooled_ref[...] = acc_ref[...] * inv_hw


def _scale_kernel(x_ref, gate_ref, o_ref):
    x = x_ref[...].astype(jnp.float32)                           # (1, C, hw_t)
    o_ref[...] = (x * gate_ref[...]).astype(o_ref.dtype)         # gate (1, C, 1)


def _se_two_pass(x3, w1, w2, *, block_budget_bytes, vmem_limit, inv_hw):
    B, C, HW = x3.shape
    itemsize = jnp.dtype(x3.dtype).itemsize

    # Pass-2 live bytes per spatial element of a (1, C, hw_t) block:
    # 2x input + 2x output (double buffered) + one f32 compute temp.
    per_elem = C * (4 * itemsize + 4)
    hw_t = max(128, (block_budget_bytes // max(per_elem, 1)) // 128 * 128)
    if hw_t >= HW:
        hw_t = HW             # single full-dim chunk is always legal
    grid_hw = pl.cdiv(HW, hw_t)
    grid_b = B                # bt == 1 in this regime

    pooled = pl.pallas_call(
        functools.partial(_pool_kernel, hw_total=HW, inv_hw=inv_hw),
        out_shape=jax.ShapeDtypeStruct((B, C, 1), jnp.float32),
        grid_spec=pltpu.PrefetchScalarGridSpec(
            num_scalar_prefetch=0,
            grid=(grid_b, grid_hw),
            in_specs=[pl.BlockSpec((1, C, hw_t), lambda b, h: (b, 0, h))],
            out_specs=pl.BlockSpec((1, C, 1), lambda b, h: (b, 0, 0)),
            scratch_shapes=[pltpu.VMEM((1, C, 1), jnp.float32)],
        ),
        compiler_params=pltpu.CompilerParams(
            dimension_semantics=("parallel", "arbitrary"),
            vmem_limit_bytes=vmem_limit,
        ),
    )(x3)

    # Tiny excitation MLP on the pooled (B, C) vector; its FLOPs are noise
    # next to the two x streams, so plain JAX is fine here.
    y = pooled[:, :, 0]
    gate = jax.nn.sigmoid(
        jnp.maximum(y @ w1.astype(jnp.float32), 0.0) @ w2.astype(jnp.float32))
    gate = gate[:, :, None]                                      # (B, C, 1) f32

    return pl.pallas_call(
        _scale_kernel,
        out_shape=jax.ShapeDtypeStruct((B, C, HW), x3.dtype),
        grid_spec=pltpu.PrefetchScalarGridSpec(
            num_scalar_prefetch=0,
            grid=(grid_b, grid_hw),
            in_specs=[pl.BlockSpec((1, C, hw_t), lambda b, h: (b, 0, h)),
                      pl.BlockSpec((1, C, 1), lambda b, h: (b, 0, 0))],
            out_specs=pl.BlockSpec((1, C, hw_t), lambda b, h: (b, 0, h)),
        ),
        compiler_params=pltpu.CompilerParams(
            dimension_semantics=("parallel", "parallel"),
            vmem_limit_bytes=vmem_limit,
        ),
    )(x3, gate)


# ---------------------------------------------------------------------------
# Public wrapper
# ---------------------------------------------------------------------------

def se_block(x, w1, w2, *, block_budget_bytes=None):
    """x: (B, C, H, W) NCHW.  w1: (C, C//ratio).  w2: (C//ratio, C)."""
    B, C, H, W = x.shape
    HW = H * W
    inv_hw = 1.0 / HW
    x3 = x.reshape(B, C, HW)          # free reshape (contiguous last dims)

    vmem_phys, num_tc = _vmem_and_num_tc()
    vmem_limit = (vmem_phys // 8) * 7                 # 56 MiB v7x / 112 MiB v5e,v6e
    vmem_limit = max(32 * 1024 * 1024, min(vmem_limit, 112 * 1024 * 1024))
    if block_budget_bytes is None:
        # Same budget the compiler gets, minus headroom for w1/w2, semaphores
        # and compiler-internal scratch.
        block_budget_bytes = vmem_limit - 4 * 1024 * 1024

    itemsize = jnp.dtype(x.dtype).itemsize
    # Per batch row: 2x input block + 2x output block (double buffered) plus
    # one f32 compute temp when the storage dtype is sub-32-bit.
    per_row = C * HW * (4 * itemsize + (4 if itemsize < 4 else 0))

    if per_row <= block_budget_bytes:
        bt = _choose_bt(B, per_row, block_budget_bytes, num_tc)
        out = _se_fused(x3, w1, w2, bt=bt, vmem_limit=vmem_limit, inv_hw=inv_hw)
    else:
        out = _se_two_pass(x3, w1, w2, block_budget_bytes=block_budget_bytes,
                           vmem_limit=vmem_limit, inv_hw=inv_hw)
    return out.reshape(B, C, H, W)


def se_block_ref(x, w1, w2):
    """Pure-JAX reference matching the PyTorch forward exactly."""
    y = jnp.mean(x, axis=(2, 3))                      # AdaptiveAvgPool2d((1,1))
    y = jnp.maximum(y @ w1, 0.0)                      # Linear(no bias) + ReLU
    y = jax.nn.sigmoid(y @ w2)                        # Linear(no bias) + Sigmoid
    return x * y[:, :, None, None]                    # broadcast over (H, W)


# ---------------------------------------------------------------------------
# Self-test
# ---------------------------------------------------------------------------

def _run_case(key, B, C, H, W, ratio, block_budget_bytes=None):
    Cr = C // ratio
    kx, k1, k2 = jax.random.split(key, 3)
    x = jax.random.normal(kx, (B, C, H, W), dtype=jnp.float32)
    # torch nn.Linear(C, Cr, bias=False) weight is (Cr, C); stored transposed
    # so the kernel computes y @ w1 directly.
    w1 = jax.random.normal(k1, (C, Cr), dtype=jnp.float32) * (1.0 / (C ** 0.5))
    w2 = jax.random.normal(k2, (Cr, C), dtype=jnp.float32) * (1.0 / (Cr ** 0.5))

    out = jax.block_until_ready(
        se_block(x, w1, w2, block_budget_bytes=block_budget_bytes))
    ref = se_block_ref(x, w1, w2)
    assert out.shape == (B, C, H, W)
    assert jnp.allclose(out, ref, atol=1e-5, rtol=1e-5), (
        f"mismatch vs reference for shape {(B, C, H, W)}")


if __name__ == "__main__":
    key = jax.random.PRNGKey(0)
    keys = jax.random.split(key, 4)

    # SE_Block(inchannel=64, ratio=16): lane-dense spatial (16x16 = 256).
    _run_case(keys[0], B=2, C=64, H=16, W=16, ratio=16)

    # Non-128-multiple spatial (7x7 = 49): masked output stores, no padding.
    _run_case(keys[1], B=3, C=32, H=7, W=7, ratio=8)

    # Tiny forced block budget: exercises the ragged last batch block path.
    _run_case(keys[2], B=5, C=16, H=8, W=8, ratio=4, block_budget_bytes=40_000)

    # Even tinier budget: exercises the two-pass (pool -> scale) fallback with
    # a ragged last HW chunk (15x15 = 225, chunks of 128).
    _run_case(keys[3], B=3, C=32, H=15, W=15, ratio=8,
              block_budget_bytes=64 * 1024)

    print("KERNEL_OK")
</pallas_src>

<mosaic_0001>
module attributes {stable_mosaic.version = 11 : i64} {
  func.func @_se_fused_kernel(%arg0: i32, %arg1: memref<1x64x256xf32, #tpu.memory_space<vmem>>, %arg2: memref<64x4xf32, #tpu.memory_space<vmem>>, %arg3: memref<4x64xf32, #tpu.memory_space<vmem>>, %arg4: memref<1x64x256xf32, #tpu.memory_space<vmem>>) attributes {dimension_semantics = [#tpu.dimension_semantics<parallel>], iteration_bounds = array<i64: 2>, scalar_prefetch = 0 : i64, scratch_operands = 0 : i64, tpu.core_type = #tpu.core_type<tc>, window_params = [{transform_indices = @transform_0, window_bounds = array<i64: 1, 64, 256>}, {pipeline_mode = #tpu.pipeline_mode<synchronous>, transform_indices = @transform_1, window_bounds = array<i64: 64, 4>}, {pipeline_mode = #tpu.pipeline_mode<synchronous>, transform_indices = @transform_2, window_bounds = array<i64: 4, 64>}, {transform_indices = @transform_3, window_bounds = array<i64: 1, 64, 256>}]} {
    %c0 = arith.constant 0 : index
    %c0_0 = arith.constant 0 : index
    %c0_1 = arith.constant 0 : index
    %0 = vector.load %arg1[%c0, %c0_0, %c0_1] : memref<1x64x256xf32, #tpu.memory_space<vmem>>, vector<1x64x256xf32>
    %cst = arith.constant dense<0.000000e+00> : vector<1x64xf32>
    %1 = vector.multi_reduction <add>, %0, %cst [2] : vector<1x64x256xf32> to vector<1x64xf32>
    %cst_2 = arith.constant 3.906250e-03 : f32
    %2 = vector.broadcast %cst_2 : f32 to vector<1x64xf32>
    %3 = arith.mulf %1, %2 : vector<1x64xf32>
    %c0_3 = arith.constant 0 : index
    %c0_4 = arith.constant 0 : index
    %4 = vector.load %arg2[%c0_3, %c0_4] : memref<64x4xf32, #tpu.memory_space<vmem>>, vector<64x4xf32>
    %cst_5 = arith.constant dense<0.000000e+00> : vector<1x4xf32>
    %5 = tpu.matmul %3, %4, %cst_5 {dimension_numbers = #tpu.dot_dimension_numbers<[1], [0], [0], [1], [0, 0, 1, 1], [], []>} : vector<1x64xf32>, vector<64x4xf32>, vector<1x4xf32> -> vector<1x4xf32>
    %cst_6 = arith.constant 0.000000e+00 : f32
    %6 = vector.broadcast %cst_6 : f32 to vector<1x4xf32>
    %7 = arith.maximumf %5, %6 : vector<1x4xf32>
    %c0_7 = arith.constant 0 : index
    %c0_8 = arith.constant 0 : index
    %8 = vector.load %arg3[%c0_7, %c0_8] : memref<4x64xf32, #tpu.memory_space<vmem>>, vector<4x64xf32>
    %cst_9 = arith.constant dense<0.000000e+00> : vector<1x64xf32>
    %9 = tpu.matmul %7, %8, %cst_9 {dimension_numbers = #tpu.dot_dimension_numbers<[1], [0], [0], [1], [0, 0, 1, 1], [], []>} : vector<1x4xf32>, vector<4x64xf32>, vector<1x64xf32> -> vector<1x64xf32>
    %10 = arith.negf %9 : vector<1x64xf32>
    %11 = math.exp %10 : vector<1x64xf32>
    %cst_10 = arith.constant 1.000000e+00 : f32
    %12 = vector.broadcast %cst_10 : f32 to vector<1x64xf32>
    %13 = arith.addf %12, %11 : vector<1x64xf32>
    %14 = arith.divf %12, %13 : vector<1x64xf32>
    %15 = vector.shape_cast %14 : vector<1x64xf32> to vector<1x64x1xf32>
    %16 = vector.broadcast %15 : vector<1x64x1xf32> to vector<1x64x256xf32>
    %17 = arith.mulf %0, %16 : vector<1x64x256xf32>
    %c0_11 = arith.constant 0 : index
    %c0_12 = arith.constant 0 : index
    %c0_13 = arith.constant 0 : index
    %18 = vector.load %arg4[%c0_11, %c0_12, %c0_13] : memref<1x64x256xf32, #tpu.memory_space<vmem>>, vector<1x64x256xf32>
    tpu.vector_store %arg4[%c0_11, %c0_12, %c0_13], %17 {strides = array<i32>} : memref<1x64x256xf32, #tpu.memory_space<vmem>>, vector<1x64x256xf32>,
    return
  }
  func.func @transform_0(%arg0: i32) -> (i32, i32, i32) {
    %c0_i32 = arith.constant 0 : i32
    %c0_i32_0 = arith.constant 0 : i32
    %c0_i32_1 = arith.constant 0 : i32
    return %arg0, %c0_i32, %c0_i32_0 : i32, i32, i32
  }
  func.func @transform_1(%arg0: i32) -> (i32, i32) {
    %c0_i32 = arith.constant 0 : i32
    %c0_i32_0 = arith.constant 0 : i32
    %c0_i32_1 = arith.constant 0 : i32
    return %c0_i32, %c0_i32_0 : i32, i32
  }
  func.func @transform_2(%arg0: i32) -> (i32, i32) {
    %c0_i32 = arith.constant 0 : i32
    %c0_i32_0 = arith.constant 0 : i32
    %c0_i32_1 = arith.constant 0 : i32
    return %c0_i32, %c0_i32_0 : i32, i32
  }
  func.func @transform_3(%arg0: i32) -> (i32, i32, i32) {
    %c0_i32 = arith.constant 0 : i32
    %c0_i32_0 = arith.constant 0 : i32
    %c0_i32_1 = arith.constant 0 : i32
    return %arg0, %c0_i32, %c0_i32_0 : i32, i32, i32
  }
}

</mosaic_0001>

<bundles_post_ra>
// kernel: tpu_custom_call.1
= control target key start
LH: loop header
LB: loop body
LE: loop exit
PB: predicated region body
PF: predicated region fallthrough
CT: control target
= control target key end

     0   :  { %8 = vsyncpa [#allocation3], 0  ;;  %s1160_s0 = inlined_call_operand.hbm [shape: f32[2,64,256], index: 0, kind: input, shape index: {}]   ;;  %s1161_s1 = inlined_call_operand.vmem [shape: f32[64,4], index: 1, kind: input, shape index: {}]   ;;  %s1162_s2 = inlined_call_operand.vmem [shape: f32[4,64], index: 2, kind: input, shape index: {}]   ;;  %s1163_s3 = inlined_call_operand.hbm [shape: f32[2,64,256], index: 3, kind: output, shape index: {}]  }
   0x1   :  { %10 = vsyncpa [#allocation3 + $0x1], 0 }
   0x2   :  { %11 = vsyncpa [#allocation4], 0 }
   0x3   :  { %13 = vsyncpa [#allocation4 + $0x1], 0  ;;  %s872_s12 = smov 0   ;;  %s874_s13 = smov 0  }
   0x4   :  { %s876_s14 = smov 0   ;;  %s878_s15 = smov 0  }
   0x5 LB: > { %s893_s16 = sadd.s32 4294967295, %s841_s15   ;;  %s621_s17 = sadd.s32 4294967294, %s841_s15   ;;  %s841_s15 = sphi %s878_s15, %s1176_s15   ;;  %s837_s14 = sphi %s876_s14, %s1175_s14   ;;  %s833_s13 = sphi %s874_s13, %s1174_s13   ;;  %s829_s12 = sphi %s872_s12, %s1173_s12  }
   0x6   : > { %s897_s18 = sadd.s32 1, %s841_s15   ;;  %s26_s19 = sadd.s32 1, %s837_s14 }
   0x7   : > { %s23_s20 = ssub.s32 %s841_s15, %s897_s18  ;;  %p33_p0 = scmp.ne.s32.totalorder %s837_s14, %s833_s13 }
   0x8   : > { %p24_p1 = scmp.eq.s32.totalorder %s23_s20, 0  ;;  %p34_p2 = scmp.eq.s32.totalorder %s841_s15, 0 }
   0x9   : > { %p39_p3 = scmp.ne.s32.totalorder %s833_s13, %s829_s12  ;;  %p40_p4 = scmp.eq.s32.totalorder %s893_s16, 0 }
   0xa   : > { %s909_s21 = scalar_select %p24_p1, %s837_s14, %s26_s19  }
   0xb   : > { %p911_p5 = por %p34_p2, %p33_p0  ;;  %p915_p6 = por %p40_p4, %p39_p3 }
   0xc   : > { %p105_p7 = scmp.eq.s32.totalorder %s893_s16, 1  ;;  %p111_p8 = scmp.eq.s32.totalorder %s621_s17, 1 }
   0xd   : > { %p700_p10 = scmp.lt.s32.totalorder %s841_s15, 2  ;;  %s137_s26 = sand.u32 1, %s837_s14  }
   0xe   : > { %p922_p11 = por %p105_p7, %p33_p0  ;;  %p926_p12 = por %p111_p8, %p39_p3 }
   0xf   : > { %s639_s27 = sshll.u32 %s841_s15, 11  ;;  %s624_s28 = sshll.u32 %s137_s26, 7 }
  0x10   : > { %s1167_s24 = scalar_select %p922_p11, 1, 0 }
  0x11   : > { %s1168_s25 = scalar_select %p926_p12, 1, 0 }
  0x12   : > { %s935_s4 = scalar_lea.hbm %s1160_s0, %s639_s27  ;;  %s141_s5 = scalar_lea.vmem [#allocation2], %s624_s28 }
  0x13   : > { %s148_s6 = sshll.u32 %s141_s5, 4  ;;  %p939_p13 = pnand %p700_p10, %p911_p5  ;;  %s943_s6 = int_to_ptr.vmem [resolvable:$true] %s148_s6 }
  0x14   : > { %s945_s8 = scalar_lea.sflag [#allocation3], %s137_s26  ;;  %s745_s9 = scalar_lea.hbm %s935_s4, 2048 }
  0x15   : > { %p746_p0 = scmp.ne.s32.totalorder %s935_s4, %s745_s9  ;;  %p747_p1 = pneg %p939_p13 }
  0x16   : > { %s750_s17 = scalar_lea.hbm %s1160_s0, 4096  ;;  %p751_p4 = scmp.lt.u32.totalorder %s935_s4, %s1160_s0 }
  0x17   : > { %p748_p2 = pnand %p747_p1, %p746_p0  ;;  %p752_p5 = scmp.lt.u32.totalorder %s750_s17, %s745_s9 }
  0x18   : > { %p754_p8 = scmp.lt.u32.totalorder %s745_s9, %s935_s4 }
  0x19   : > { %p749_p3 = pneg %p748_p2  ;;  %p753_p7 = por %p752_p5, %p751_p4 }
  0x1b   : > { %p755_p10 = por %p754_p8, %p753_p7 }
  0x1d   : > { %p756_p9 = pnand %p755_p10, %p749_p3 }
  0x1f   : > { %759 = shalt.err (!%p756_p9)
}
  0x20   : > { %s760_s22 = scalar_lea.vmem %s943_s6, 2048  ;;  %s843_s26 = smov [#allocation2]  }
  0x21   : > { %p761_p0 = scmp.ne.s32.totalorder %s943_s6, %s760_s22  ;;  %s765_s27 = sshll.u32 %s843_s26, 4  ;;  %s766_s27 = int_to_ptr.vmem [resolvable:$false] %s765_s27 }
  0x22   : > { %s767_s28 = scalar_lea.vmem %s766_s27, 4096  ;;  %p768_p11 = scmp.lt.s32.totalorder %s943_s6, %s766_s27 }
  0x23   : > { %p763_p2 = pnand %p761_p0, %p747_p1  ;;  %p769_p4 = scmp.lt.s32.totalorder %s767_s28, %s760_s22 }
  0x25   : > { %p764_p12 = pneg %p763_p2  ;;  %p770_p5 = por %p769_p4, %p768_p11 }
  0x27   : > { %p771_p7 = pnand %p770_p5, %p764_p12 }
  0x29   : > { %774 = shalt.err (!%p771_p7)
}
  0x2a   : > { %s844_s29 = smov 256   ;;  %s845_s30 = smov 16  }
  0x2b   : > { %695 = dma.hbm_to_vmem [thread:$0]  (!%p939_p13), %s935_s4, 2048, %s943_s6, %s945_s8, %s844_s29, %s844_s29, %s845_s30  }
  0x2c   : > { %p627_p9 = scmp.ge.s32.totalorder %s841_s15, 1  ;;  %p156_p1 = scmp.lt.s32.totalorder %s841_s15, 3 }
  0x2e   : > { %p157_p3 = pnand %p627_p9, %p156_p1 }
  0x2f   : > { %s976_s5 = sand.u32 (!%p157_p3), 1, %s833_s13  }
  0x30   : > { %160 = sbr.rel (%p157_p3) target bundleno = 821 (0x335), region = 32  ;;  %s628_s9 = sshll.u32 (!%p157_p3), %s976_s5, 7 }
  0x31   : > { %s163_s10 = scalar_lea.sflag (!%p157_p3), [#allocation3], %s976_s5  ;;  %s166_s11 = scalar_lea.vmem (!%p157_p3), [#allocation2], %s628_s9 }
  0x37   : > { %820 = dma.done.wait (%p915_p6), %s163_s10, 2048  }
  0x38   : > { %822 = vsyncadd (%p915_p6), %s163_s10, 4294965248  ;;  %v986_v0 = vld [vmem:[%s166_s11] sm:$0xff]  ;;  %v988_v1 = vld [vmem:[%s166_s11 + $0x8] sm:$0xff]  ;;  %v846_v27 = vmov 0.0|0.0   ;;  %vm847_vm0 = vmmov 0   ;;  %v848_v37 = vmov 0.0   ;;  %v253_v38 = vlaneseq }
  0x39   : > { %v990_v2 = vld [vmem:[%s166_s11 + $0x20] sm:$0xff]  ;;  %v205_v3 = vadd.f32 %v988_v1, %v986_v0  ;;  %v994_v4 = vld [vmem:[%s166_s11 + $0x28] sm:$0xff]  ;;  %v996_v5 = vld [vmem:[%s166_s11 + $0x10] sm:$0xff]  ;;  %676 = vmatprep.subr.bf16.mxu0 %v846_v27  ;;  %668 = vmatprep.mubr.msk.f32.mxu0 %vm847_vm0, %v848_v37  ;;  %vm264_vm1 = vcmask 130112   ;;  %vm271_vm2 = vcmask 195712   ;;  %vm278_vm3 = vcmask 261312  }
  0x3a   : > { %v998_v6 = vld [vmem:[%s166_s11 + $0x18] sm:$0xff]  ;;  %v211_v7 = vadd.f32 %v994_v4, %v990_v2  ;;  %v1002_v8 = vld [vmem:[%s166_s11 + $0x30] sm:$0xff]  ;;  %v1010_v12 = vld [vmem:[%s166_s11 + $0x40] sm:$0xff]  ;;  %671 = vmatprep.subr.mxu1 %v848_v37  ;;  %673 = vmatprep.mubr.msk.f32.mxu1 %vm847_vm0, %v848_v37  ;;  %v254_v39 = vand.u32 127, %v253_v38  ;;  %v1058_v40 = vshrl.u32 %v253_v38, 7  ;;  %vm285_vm4 = vcmask 326912  }
  0x3b   : > { %v1004_v9 = vld [vmem:[%s166_s11 + $0x38] sm:$0xff]  ;;  %206 = vadd.xlane.f32.xlu0 %v205_v3  ;;  %v208_v10 = vadd.f32 %v998_v6, %v996_v5  ;;  %v1012_v13 = vld [vmem:[%s166_s11 + $0x48] sm:$0xff]  ;;  %v1014_v14 = vld [vmem:[%s166_s11 + $0x50] sm:$0xff]  ;;  %vm292_vm5 = vcmask 392512   ;;  %vm299_vm6 = vcmask 458112   ;;  %vm306_vm7 = vcmask 523712  }
  0x3c   : > { %212 = vadd.xlane.f32.xlu1 %v211_v7  ;;  %v214_v11 = vadd.f32 %v1004_v9, %v1002_v8  ;;  %v1016_v15 = vld [vmem:[%s166_s11 + $0x58] sm:$0xff]  ;;  %v217_v16 = vadd.f32 %v1012_v13, %v1010_v12  ;;  %v1022_v18 = vld [vmem:[%s166_s11 + $0x60] sm:$0xff]  ;;  %v1024_v19 = vld [vmem:[%s166_s11 + $0x68] sm:$0xff]  ;;  %v259_v41 = vadd.s32 4294967288, %v254_v39  ;;  %v266_v43 = vadd.s32 4294967280, %v254_v39  ;;  %s1079_s6 = scalar_lea.vmem [#allocation5], %s628_s9 }
  0x3d   : > { %v220_v17 = vadd.f32 %v1016_v15, %v1014_v14  ;;  %v1026_v20 = vld [vmem:[%s166_s11 + $0x70] sm:$0xff]  ;;  %v1028_v21 = vld [vmem:[%s166_s11 + $0x78] sm:$0xff]  ;;  %v223_v22 = vadd.f32 %v1024_v19, %v1022_v18  ;;  %v237_v24 = vld [vmem:[%s1161_s1] sm:$0xff]  ;;  %v273_v44 = vadd.s32 4294967272, %v254_v39  ;;  %v257_v46 = vsub.s32 %v254_v39, %v1058_v40  ;;  %s640_s9 = sshll.u32 %s893_s16, 11  ;;  %s548_s7 = sshll.u32 %s1079_s6, 4  ;;  %s1112_s7 = int_to_ptr.vmem [resolvable:$true] %s548_s7 }
  0x3e   : > { %v226_v23 = vadd.f32 %v1028_v21, %v1026_v20  ;;  %v238_v25 = vld [vmem:[%s1161_s1 + $0x8] sm:$0xff]  ;;  %v239_v28 = vld [vmem:[%s1161_s1 + $0x10] sm:$0xff]  ;;  %v240_v29 = vld [vmem:[%s1161_s1 + $0x18] sm:$0xff]  ;;  %v262_v48 = vsub.s32 %v259_v41, %v1058_v40  ;;  %v280_v49 = vadd.s32 4294967264, %v254_v39  ;;  %v269_v50 = vsub.s32 %v266_v43, %v1058_v40  ;;  %s1110_s19 = scalar_lea.hbm %s1163_s3, %s640_s9  ;;  %s535_s16 = scalar_lea.sflag [#allocation4], %s976_s5 }
  0x3f   : > { %209 = vadd.xlane.f32.xlu0 %v208_v10  ;;  %v677_v26 = vpack.c.bf16 %v238_v25, %v237_v24  ;;  %v680_v30 = vpack.c.bf16 %v240_v29, %v239_v28  ;;  %v241_v31 = vld [vmem:[%s1161_s1 + $0x20] sm:$0xff]  ;;  %v242_v32 = vld [vmem:[%s1161_s1 + $0x28] sm:$0xff]  ;;  %v243_v34 = vld [vmem:[%s1161_s1 + $0x30] sm:$0xff]  ;;  %v276_v53 = vsub.s32 %v273_v44, %v1058_v40  ;;  %v287_v54 = vadd.s32 4294967256, %v254_v39  ;;  %s775_s20 = scalar_lea.vmem %s1112_s7, 2048  ;;  %p1170_p11 = scmp.ne.s32.totalorder %s1167_s24, 0 }
  0x40   : > { %215 = vadd.xlane.f32.xlu1 %v214_v11  ;;  %v683_v33 = vpack.c.bf16 %v242_v32, %v241_v31  ;;  %v244_v35 = vld [vmem:[%s1161_s1 + $0x38] sm:$0xff]  ;;  %v283_v60 = vsub.s32 %v280_v49, %v1058_v40  ;;  %v294_v61 = vadd.s32 4294967248, %v254_v39  ;;  %v301_v10 = vadd.s32 4294967240, %v254_v39  ;;  %v382_v39 = vld [vmem:[%s1162_s2] sm:$0xf]  ;;  %p776_p6 = scmp.ne.s32.totalorder %s1112_s7, %s775_s20  ;;  %s849_s22 = smov [#allocation5]  }
  0x41   : > { %678 = vmatpush3.bf16.msra.mxu0 %v677_v26  ;;  %v686_v36 = vpack.c.bf16 %v244_v35, %v243_v34  ;;  %v290_v7 = vsub.s32 %v287_v54, %v1058_v40  ;;  %vm308_vm8 = vcmask 523264   ;;  %vm387_vm9 = vcmask 1043456   ;;  %s779_s26 = sshll.u32 %s849_s22, 4  ;;  %s780_s26 = int_to_ptr.vmem [resolvable:$false] %s779_s26 }
  0x42   : > { %679 = vmatprep.subr.bf16.mxu0 %v846_v27  ;;  %v297_v26 = vsub.s32 %v294_v61, %v1058_v40  ;;  %v304_v29 = vsub.s32 %v301_v10, %v1058_v40  ;;  %672 = vmatpush3.msk.msra.mxu1 %vm387_vm9, %v382_v39  ;;  %vm383_vm10 = vcmask 31744   ;;  %v469_v49 = vsub.s32 0, %v1058_v40  ;;  %p777_p12 = pnand %p776_p6, %p1170_p11  ;;  %s781_s27 = scalar_lea.vmem %s780_s26, 4096 }
  0x43   : > { %218 = vadd.xlane.f32.xlu0 %v217_v16  ;;  %p782_p8 = scmp.lt.s32.totalorder %s1112_s7, %s780_s26  ;;  %p783_p10 = scmp.lt.s32.totalorder %s781_s27, %s775_s20 }
  0x44   : > { %221 = vadd.xlane.f32.xlu1 %v220_v17  ;;  %p778_p13 = pneg %p777_p12 }
  0x45   : > { %681 = vmatpush3.bf16.msra.mxu0 %v680_v30  ;;  %p784_p0 = por %p783_p10, %p782_p8 }
  0x46   : > { %682 = vmatprep.subr.bf16.mxu0 %v846_v27 }
  0x47   : > { %224 = vadd.xlane.f32.xlu0 %v223_v22  ;;  %p785_p2 = pnand %p784_p0, %p778_p13 }
  0x48   : > { %227 = vadd.xlane.f32.xlu1 %v226_v23 }
  0x49   : > { %684 = vmatpush3.bf16.msra.mxu0 %v683_v33 }
  0x4a   : > { %685 = vmatprep.subr.bf16.mxu0 %v846_v27 }
  0x4d   : > { %687 = vmatpush3.bf16.msra.mxu0 %v686_v36 }
  0xc8   : > { %v207_v42 = vpop.xlane.xlu0 %206 }
  0xc9   : > { %v213_v45 = vpop.xlane.xlu1 %212  ;;  %v229_v47 = vmul.f32 0.00390625, %v207_v42 }
  0xca   : > { %v231_v51 = vmul.f32 0.00390625, %v213_v45 }
  0xcb   : > { %v258_v58 = vrot.slane %v229_v47, %v257_v46 }
  0xcc   : > { %v210_v52 = vpop.xlane.xlu0 %209  ;;  %v270_v62 = vrot.slane %v231_v51, %v269_v50 }
  0xcd   : > { %v230_v55 = vmul.f32 0.00390625, %v210_v52  ;;  %v216_v56 = vpop.xlane.xlu1 %215 }
  0xce   : > { %v232_v57 = vmul.f32 0.00390625, %v216_v56 }
  0xcf   : > { %v263_v59 = vrot.slane %v230_v55, %v262_v48 }
  0xd0   : > { %v277_v63 = vrot.slane %v232_v57, %v276_v53  ;;  %v219_v3 = vpop.xlane.xlu0 %218 }
  0xd1   : > { %v265_v11 = vsel %vm264_vm1, %v263_v59, %v258_v58  ;;  %v233_v16 = vmul.f32 0.00390625, %v219_v3  ;;  %v222_v17 = vpop.xlane.xlu1 %221 }
  0xd2   : > { %v272_v22 = vsel %vm271_vm2, %v270_v62, %v265_v11  ;;  %v234_v23 = vmul.f32 0.00390625, %v222_v17 }
  0xd3   : > { %v279_v24 = vsel %vm278_vm3, %v277_v63, %v272_v22  ;;  %v284_v25 = vrot.slane %v233_v16, %v283_v60 }
  0xd4   : > { %v291_v27 = vrot.slane %v234_v23, %v290_v7  ;;  %v225_v28 = vpop.xlane.xlu0 %224 }
  0xd5   : > { %v286_v30 = vsel %vm285_vm4, %v284_v25, %v279_v24  ;;  %v235_v31 = vmul.f32 0.00390625, %v225_v28  ;;  %v228_v32 = vpop.xlane.xlu1 %227 }
  0xd6   : > { %v236_v33 = vmul.f32 0.00390625, %v228_v32  ;;  %v293_v35 = vsel %vm292_vm5, %v291_v27, %v286_v30 }
  0xd7   : > { %v298_v34 = vrot.slane %v235_v31, %v297_v26 }
  0xd8   : > { %v305_v36 = vrot.slane %v236_v33, %v304_v29 }
  0xd9   : > { %v300_v37 = vsel %vm299_vm6, %v298_v34, %v293_v35 }
  0xda   : > { %v307_v38 = vsel %vm306_vm7, %v305_v36, %v300_v37 }
  0xdb   : > { %669 = vmatmul.mubr.msk.f32.vlgmr.msra.gmra.mrb[0].mxu0 %vm308_vm8, %v307_v38 }
 0x1ae   : > { %v377_v41 = vpop.f32.mrb[0].mxu0 }
 0x1af   : > { %v381_v42 = vmax.f32 %v377_v41, 0.0  ;;  %v670_v43 = vpop.f32.mrb[1].mxu0 }
 0x1b1   : > { %674 = vmatmul.mubr.msk.f32.vlgmr.msra.gmra.mrb[0].mxu1 %vm383_vm10, %v381_v42 }
 0x284   : > { %v457_v44 = vpop.f32.mrb[0].mxu1 }
 0x285   : > { %v633_v45 = vmul.f32 -1.442695, %v457_v44  ;;  %v675_v46 = vpop.f32.mrb[1].mxu1 }
 0x287   : > { %741 = vpow2.f32 %v633_v45 }
 0x291   : > { %v742_v47 = vpop.eup %741 }
 0x292   : > { %v464_v48 = vadd.f32 1.0, %v742_v47 }
 0x294   : > { %743 = vrcp.f32 %v464_v48 }
 0x29e   : > { %v744_v50 = vpop.eup %743 }
 0x29f   : > { %v470_v51 = vrot.slane %v744_v50, %v469_v49 }
 0x2a1   : > { %476 = vbcast.lane.b32.xlu1 %v470_v51, 264  ;;  %472 = vbcast.lane.b32.xlu0 %v470_v51, 256 }
 0x2a5   : > { %480 = vbcast.lane.b32.xlu1 %v470_v51, 272  ;;  %488 = vbcast.lane.b32.xlu0 %v470_v51, 288 }
 0x2a9   : > { %484 = vbcast.lane.b32.xlu1 %v470_v51, 280  ;;  %496 = vbcast.lane.b32.xlu0 %v470_v51, 304 }
 0x2ad   : > { %492 = vbcast.lane.b32.xlu1 %v470_v51, 296 }
 0x2b1   : > { %500 = vbcast.lane.b32.xlu1 %v470_v51, 312 }
 0x313   : > { %v477_v52 = vpop.permute.xlu1 %476  ;;  %v473_v53 = vpop.permute.xlu0 %472 }
 0x314   : > { %v504_v54 = vmul.f32 %v477_v52, %v996_v5  ;;  %v505_v55 = vmul.f32 %v477_v52, %v998_v6  ;;  %v502_v56 = vmul.f32 %v473_v53, %v986_v0  ;;  %v503_v40 = vmul.f32 %v473_v53, %v988_v1 }
 0x316   : > { %520 = vst [vmem:[%s1079_s6 + $0x10] sm:$0xff] %v504_v54  ;;  %521 = vst [vmem:[%s1079_s6 + $0x18] sm:$0xff] %v505_v55 }
 0x317   : > { %518 = vst [vmem:[%s1079_s6] sm:$0xff] %v502_v56  ;;  %519 = vst [vmem:[%s1079_s6 + $0x8] sm:$0xff] %v503_v40  ;;  %v481_v5 = vpop.permute.xlu1 %480  ;;  %v489_v0 = vpop.permute.xlu0 %488 }
 0x318   : > { %v506_v1 = vmul.f32 %v481_v5, %v990_v2  ;;  %v507_v6 = vmul.f32 %v481_v5, %v994_v4  ;;  %v510_v57 = vmul.f32 %v489_v0, %v1010_v12  ;;  %v511_v58 = vmul.f32 %v489_v0, %v1012_v13 }
 0x31a   : > { %522 = vst [vmem:[%s1079_s6 + $0x20] sm:$0xff] %v506_v1  ;;  %523 = vst [vmem:[%s1079_s6 + $0x28] sm:$0xff] %v507_v6 }
 0x31b   : > { %526 = vst [vmem:[%s1079_s6 + $0x40] sm:$0xff] %v510_v57  ;;  %527 = vst [vmem:[%s1079_s6 + $0x48] sm:$0xff] %v511_v58  ;;  %v485_v59 = vpop.permute.xlu1 %484  ;;  %v497_v60 = vpop.permute.xlu0 %496 }
 0x31c   : > { %v508_v2 = vmul.f32 %v485_v59, %v1002_v8  ;;  %v509_v61 = vmul.f32 %v485_v59, %v1004_v9  ;;  %v514_v4 = vmul.f32 %v497_v60, %v1022_v18  ;;  %v515_v12 = vmul.f32 %v497_v60, %v1024_v19 }
 0x31e   : > { %524 = vst [vmem:[%s1079_s6 + $0x30] sm:$0xff] %v508_v2  ;;  %525 = vst [vmem:[%s1079_s6 + $0x38] sm:$0xff] %v509_v61 }
 0x31f   : > { %530 = vst [vmem:[%s1079_s6 + $0x60] sm:$0xff] %v514_v4  ;;  %531 = vst [vmem:[%s1079_s6 + $0x68] sm:$0xff] %v515_v12  ;;  %v493_v13 = vpop.permute.xlu1 %492 }
 0x320   : > { %v512_v62 = vmul.f32 %v493_v13, %v1014_v14  ;;  %v513_v63 = vmul.f32 %v493_v13, %v1016_v15 }
 0x322   : > { %528 = vst [vmem:[%s1079_s6 + $0x50] sm:$0xff] %v512_v62  ;;  %529 = vst [vmem:[%s1079_s6 + $0x58] sm:$0xff] %v513_v63 }
 0x323   : > { %v501_v8 = vpop.permute.xlu1 %500 }
 0x324   : > { %v516_v9 = vmul.f32 %v501_v8, %v1026_v20  ;;  %v517_v14 = vmul.f32 %v501_v8, %v1028_v21 }
 0x326   : > { %532 = vst [vmem:[%s1079_s6 + $0x70] sm:$0xff] %v516_v9  ;;  %533 = vst [vmem:[%s1079_s6 + $0x78] sm:$0xff] %v517_v14 }
 0x327   : > { %788 = shalt.err (!%p785_p2)
}
 0x328   : > { %s789_s28 = scalar_lea.hbm %s1110_s19, 2048  ;;  %s793_s10 = scalar_lea.hbm %s1163_s3, 4096 }
 0x329   : > { %p790_p4 = scmp.ne.s32.totalorder %s1110_s19, %s789_s28  ;;  %p794_p9 = scmp.lt.u32.totalorder %s1110_s19, %s1163_s3 }
 0x32a   : > { %p795_p1 = scmp.lt.u32.totalorder %s793_s10, %s789_s28  ;;  %p797_p6 = scmp.lt.u32.totalorder %s789_s28, %s1110_s19 }
 0x32b   : > { %p791_p5 = pnand %p790_p4, %p1170_p11 }
 0x32c   : > { %p796_p3 = por %p795_p1, %p794_p9 }
 0x32d   : > { %p792_p7 = pneg %p791_p5 }
 0x32e   : > { %p798_p12 = por %p797_p6, %p796_p3 }
 0x330   : > { %p799_p13 = pnand %p798_p12, %p792_p7 }
 0x332   : > { %802 = shalt.err (!%p799_p13)
}
 0x333   : > { %s850_s4 = smov 256   ;;  %s851_s6 = smov 16  }
 0x334   : > { %690 = dma.vmem_to_hbm [thread:$0]  (%p1170_p11), %s1112_s7, 2048, %s1110_s19, %s535_s16, %s850_s4, %s850_s4, %s851_s6  }
 0x335 PF: > { %s563_s9 = sand.u32 1, %s829_s12   ;;  %p1171_p8 = scmp.ne.s32.totalorder %s1168_s25, 0 }
 0x336   : > { %p1172_p10 = scmp.ge.s32.totalorder %s841_s15, 2  ;;  %s564_s8 = scalar_lea.sflag [#allocation4], %s563_s9 }
 0x338   : > { %p697_p0 = pnand %p1172_p10, %p1171_p8 }
 0x33a   : > { %824 = dma.done.wait (!%p697_p0), %s564_s8, 2048  }
 0x33b   : > { %826 = vsyncadd (!%p697_p0), %s564_s8, 4294965248  ;;  %p16_p2 = scmp.ge.s32.totalorder %s897_s18, 4   ;;  %s1173_s12 = smov %s833_s13 }
 0x33c   : > { %s1174_s13 = smov %s837_s14  ;;  %s1175_s14 = smov %s909_s21 }
 0x33d   : > { %s1176_s15 = smov %s897_s18  ;;  %18 = sbr.rel (!%p16_p2) target bundleno = 5 (0x5), region = 77 }
 0x344   :  { %569 = vsyncpa [#allocation3], 1 }
 0x345   :  { %571 = vsyncpa [#allocation3 + $0x1], 1 }
 0x346   :  { %572 = vsyncpa [#allocation4], 1 }
 0x347   :  { %574 = vsyncpa [#allocation4 + $0x1], 1 }

</bundles_post_ra>
